<compile_context>
chip_gen: v5e
topology: v5e:2x2
jax: 0.10.0
libtpu: 0.0.40
codegen_flags: <defaults>
</compile_context>

<pallas_src>
import functools

import jax
import jax.numpy as jnp
from jax import lax
from jax.experimental import pallas as pl
from jax.experimental.pallas import tpu as pltpu


# ----------------------------------------------------------------------------
# Pallas kernel
# ----------------------------------------------------------------------------
def _layernorm_kernel(x_ref, wb_ref, o_ref, *, eps, inv_d):
    # x_ref: (TM, D) tile of rows; wb_ref: (2, D) f32 [weight; bias]; o_ref: (TM, D).
    x = x_ref[...].astype(jnp.float32)

    # One-pass statistics: the two row reductions are independent (no serialized
    # mean -> centered -> variance chain) and no centered copy is materialized
    # before the reduce. f32 accumulation keeps E[x^2]-mean^2 cancellation benign
    # for LN-scale activations.
    mean = jnp.sum(x, axis=-1, keepdims=True) * inv_d
    mean_sq = jnp.sum(x * x, axis=-1, keepdims=True) * inv_d
    var = jnp.maximum(mean_sq - mean * mean, 0.0)

    inv = lax.rsqrt(var + eps)            # EUP slot -> effectively free
    w = wb_ref[0:1, :]                    # (1, D) f32, resident across grid steps
    b = wb_ref[1:2, :]                    # zeros when the module has bias=False
    y = (x - mean) * inv * w + b
    o_ref[...] = y.astype(o_ref.dtype)


# ----------------------------------------------------------------------------
# Block-size / VMEM sizing
# ----------------------------------------------------------------------------
_FALLBACK_VMEM_CAPACITY = 64 * 1024 * 1024   # conservative (v7x per-TC physical)


def _vmem_capacity_bytes():
    try:
        return int(pltpu.get_tpu_info().vmem_capacity_bytes)
    except Exception:
        return _FALLBACK_VMEM_CAPACITY


def _pick_block_rows(m, d, x_dtype, vmem_limit):
    itemsize = jnp.dtype(x_dtype).itemsize
    # Packed-sublane alignment: f32 -> 8, bf16 -> 16, int8/fp8 -> 32.
    align = max(8, 32 // itemsize)
    if m <= align:
        return m  # full-extent row block is always legal

    # Per-row VMEM working set: input + output, each double-buffered, in the I/O
    # dtype, plus ~3 block-sized f32 temps the compiler materializes.
    bytes_per_row = d * (4 * itemsize + 3 * 4)
    budget = int(vmem_limit * 0.6)
    tm = budget // max(1, bytes_per_row)

    # Guarantee several grid steps when M allows, so the "parallel" axis shards
    # across v7x's 2 TensorCores and the DMA pipeline has steps to overlap.
    target_steps = 8
    per_step = -(-m // target_steps)
    per_step = -(-per_step // align) * align
    tm = min(tm, per_step)

    tm = min(tm, -(-m // align) * align)   # never exceed (align-padded) M
    tm = max(align, (tm // align) * align)
    # TODO(synk): for extremely wide D where even `align` rows exceed the VMEM
    # budget, tile the feature dim with two-pass statistics instead.
    return tm


# ----------------------------------------------------------------------------
# Wrapper
# ----------------------------------------------------------------------------
def layer_norm(x, weight, bias=None, *, eps=1e-5, block_rows=None):
    """LayerNorm over the last dim. x: (..., D); weight/bias: (D,)."""
    orig_shape = x.shape
    d = orig_shape[-1]
    m = 1
    for s in orig_shape[:-1]:
        m *= s
    x2 = x.reshape(m, d)

    vmem_limit = max(16 * 1024 * 1024, int(_vmem_capacity_bytes() * 0.75))
    if block_rows is None:
        block_rows = _pick_block_rows(m, d, x.dtype, vmem_limit)

    # Fuse weight + bias into one resident (2, D) f32 buffer (one DMA stream,
    # one double-buffer slot, no per-step casts). Zeros row when bias is None.
    w32 = weight.reshape(1, d).astype(jnp.float32)
    b32 = (jnp.zeros((1, d), jnp.float32) if bias is None
           else bias.reshape(1, d).astype(jnp.float32))
    wb = jnp.concatenate([w32, b32], axis=0)

    grid = (pl.cdiv(m, block_rows),)  # tail block handled by Pallas masking; no jnp.pad

    kernel = functools.partial(_layernorm_kernel, eps=eps, inv_d=1.0 / d)

    out = pl.pallas_call(
        kernel,
        out_shape=jax.ShapeDtypeStruct((m, d), x.dtype),
        grid=grid,
        in_specs=[
            pl.BlockSpec((block_rows, d), lambda i: (i, 0)),
            pl.BlockSpec((2, d), lambda i: (0, 0)),
        ],
        out_specs=pl.BlockSpec((block_rows, d), lambda i: (i, 0)),
        compiler_params=pltpu.CompilerParams(
            dimension_semantics=("parallel",),
            vmem_limit_bytes=vmem_limit,
        ),
    )(x2, wb)
    return out.reshape(orig_shape)


# ----------------------------------------------------------------------------
# Pure-JAX reference (for correctness check)
# ----------------------------------------------------------------------------
def layer_norm_ref(x, weight, bias=None, eps=1e-5):
    x32 = x.astype(jnp.float32)
    mean = jnp.mean(x32, axis=-1, keepdims=True)
    var = jnp.mean(jnp.square(x32 - mean), axis=-1, keepdims=True)
    y = (x32 - mean) * lax.rsqrt(var + eps) * weight.astype(jnp.float32)
    if bias is not None:
        y = y + bias.astype(jnp.float32)
    return y.astype(x.dtype)


if __name__ == "__main__":
    key = jax.random.PRNGKey(0)
    kx, kw, kb = jax.random.split(key, 3)

    # Small transformer-style input: (batch, seq, hidden). Hidden is a multiple
    # of 128 so output stores stay lane-dense.
    B, T, D = 2, 16, 256
    x = jax.random.normal(kx, (B, T, D), jnp.float32)
    weight = 1.0 + 0.1 * jax.random.normal(kw, (D,), jnp.float32)
    bias = 0.1 * jax.random.normal(kb, (D,), jnp.float32)

    # bias=True variant of the module
    out_b = jax.jit(lambda a, w, b: layer_norm(a, w, b))(x, weight, bias)
    out_b = jax.block_until_ready(out_b)
    # bias=False variant (LayerNorm with bias=None)
    out_nb = jax.jit(lambda a, w: layer_norm(a, w, None))(x, weight)
    out_nb = jax.block_until_ready(out_nb)

    ref_b = layer_norm_ref(x, weight, bias)
    ref_nb = layer_norm_ref(x, weight, None)

    assert out_b.shape == (B, T, D), out_b.shape
    assert out_nb.shape == (B, T, D), out_nb.shape
    assert jnp.all(jnp.isfinite(out_b)) and jnp.all(jnp.isfinite(out_nb))
    assert jnp.allclose(out_b, ref_b, atol=1e-5, rtol=1e-5)
    assert jnp.allclose(out_nb, ref_nb, atol=1e-5, rtol=1e-5)
    print("KERNEL_OK")
</pallas_src>

<mosaic_0001>
module attributes {stable_mosaic.version = 11 : i64} {
  func.func @_layernorm_kernel(%arg0: i32, %arg1: memref<8x256xf32, #tpu.memory_space<vmem>>, %arg2: memref<2x256xf32, #tpu.memory_space<vmem>>, %arg3: memref<8x256xf32, #tpu.memory_space<vmem>>) attributes {dimension_semantics = [#tpu.dimension_semantics<parallel>], iteration_bounds = array<i64: 4>, scalar_prefetch = 0 : i64, scratch_operands = 0 : i64, tpu.core_type = #tpu.core_type<tc>, window_params = [{transform_indices = @transform_0, window_bounds = array<i64: 8, 256>}, {pipeline_mode = #tpu.pipeline_mode<synchronous>, transform_indices = @transform_1, window_bounds = array<i64: 2, 256>}, {transform_indices = @transform_2, window_bounds = array<i64: 8, 256>}]} {
    %c0 = arith.constant 0 : index
    %c0_0 = arith.constant 0 : index
    %0 = vector.load %arg1[%c0, %c0_0] : memref<8x256xf32, #tpu.memory_space<vmem>>, vector<8x256xf32>
    %cst = arith.constant dense<0.000000e+00> : vector<8xf32>
    %1 = vector.multi_reduction <add>, %0, %cst [1] : vector<8x256xf32> to vector<8xf32>
    %2 = vector.shape_cast %1 : vector<8xf32> to vector<8x1xf32>
    %cst_1 = arith.constant 3.906250e-03 : f32
    %3 = vector.broadcast %cst_1 : f32 to vector<8x1xf32>
    %4 = arith.mulf %2, %3 : vector<8x1xf32>
    %5 = arith.mulf %0, %0 : vector<8x256xf32>
    %cst_2 = arith.constant dense<0.000000e+00> : vector<8xf32>
    %6 = vector.multi_reduction <add>, %5, %cst_2 [1] : vector<8x256xf32> to vector<8xf32>
    %7 = vector.shape_cast %6 : vector<8xf32> to vector<8x1xf32>
    %cst_3 = arith.constant 3.906250e-03 : f32
    %8 = vector.broadcast %cst_3 : f32 to vector<8x1xf32>
    %9 = arith.mulf %7, %8 : vector<8x1xf32>
    %10 = arith.mulf %4, %4 : vector<8x1xf32>
    %11 = arith.subf %9, %10 : vector<8x1xf32>
    %cst_4 = arith.constant 0.000000e+00 : f32
    %12 = vector.broadcast %cst_4 : f32 to vector<8x1xf32>
    %13 = arith.maximumf %11, %12 : vector<8x1xf32>
    %cst_5 = arith.constant 9.99999974E-6 : f32
    %14 = vector.broadcast %cst_5 : f32 to vector<8x1xf32>
    %15 = arith.addf %13, %14 : vector<8x1xf32>
    %16 = math.rsqrt %15 : vector<8x1xf32>
    %c0_6 = arith.constant 0 : index
    %c0_7 = arith.constant 0 : index
    %17 = vector.load %arg2[%c0_6, %c0_7] : memref<2x256xf32, #tpu.memory_space<vmem>>, vector<1x256xf32>
    %c1 = arith.constant 1 : index
    %c0_8 = arith.constant 0 : index
    %18 = vector.load %arg2[%c1, %c0_8] : memref<2x256xf32, #tpu.memory_space<vmem>>, vector<1x256xf32>
    %19 = vector.broadcast %4 : vector<8x1xf32> to vector<8x256xf32>
    %20 = arith.subf %0, %19 : vector<8x256xf32>
    %21 = vector.broadcast %16 : vector<8x1xf32> to vector<8x256xf32>
    %22 = arith.mulf %20, %21 : vector<8x256xf32>
    %23 = vector.broadcast %17 : vector<1x256xf32> to vector<8x256xf32>
    %24 = arith.mulf %22, %23 : vector<8x256xf32>
    %25 = vector.broadcast %18 : vector<1x256xf32> to vector<8x256xf32>
    %26 = arith.addf %24, %25 : vector<8x256xf32>
    %c0_9 = arith.constant 0 : index
    %c0_10 = arith.constant 0 : index
    %27 = vector.load %arg3[%c0_9, %c0_10] : memref<8x256xf32, #tpu.memory_space<vmem>>, vector<8x256xf32>
    tpu.vector_store %arg3[%c0_9, %c0_10], %26 {strides = array<i32>} : memref<8x256xf32, #tpu.memory_space<vmem>>, vector<8x256xf32>,
    return
  }
  func.func @transform_0(%arg0: i32) -> (i32, i32) {
    %c0_i32 = arith.constant 0 : i32
    %c0_i32_0 = arith.constant 0 : i32
    return %arg0, %c0_i32 : i32, i32
  }
  func.func @transform_1(%arg0: i32) -> (i32, i32) {
    %c0_i32 = arith.constant 0 : i32
    %c0_i32_0 = arith.constant 0 : i32
    %c0_i32_1 = arith.constant 0 : i32
    return %c0_i32, %c0_i32_0 : i32, i32
  }
  func.func @transform_2(%arg0: i32) -> (i32, i32) {
    %c0_i32 = arith.constant 0 : i32
    %c0_i32_0 = arith.constant 0 : i32
    return %arg0, %c0_i32 : i32, i32
  }
}

</mosaic_0001>

<bundles_post_ra>
// kernel: _lambda_.1
= control target key start
LH: loop header
LB: loop body
LE: loop exit
PB: predicated region body
PF: predicated region fallthrough
CT: control target
= control target key end

     0   :  { %7 = vsyncpa [#allocation3], 0  ;;  %s611_s0 = inlined_call_operand.hbm [shape: f32[32,256], index: 0, kind: input, shape index: {}]   ;;  %s612_s1 = inlined_call_operand.vmem [shape: f32[2,256], index: 1, kind: input, shape index: {}]   ;;  %s613_s2 = inlined_call_operand.hbm [shape: f32[32,256], index: 2, kind: output, shape index: {}]  }
   0x1   :  { %9 = vsyncpa [#allocation3 + $0x1], 0 }
   0x2   :  { %10 = vsyncpa [#allocation4], 0 }
   0x3   :  { %12 = vsyncpa [#allocation4 + $0x1], 0  ;;  %s476_s9 = smov 0   ;;  %s478_s10 = smov 0  }
   0x4   :  { %s480_s11 = smov 0   ;;  %s482_s12 = smov 0  }
   0x5 LB: > { %s497_s13 = sadd.s32 4294967295, %s459_s12   ;;  %s298_s14 = sadd.s32 4294967294, %s459_s12   ;;  %s459_s12 = sphi %s482_s12, %s622_s12   ;;  %s455_s11 = sphi %s480_s11, %s621_s11   ;;  %s451_s10 = sphi %s478_s10, %s620_s10   ;;  %s447_s9 = sphi %s476_s9, %s619_s9  }
   0x6   : > { %s501_s15 = sadd.s32 1, %s459_s12   ;;  %s25_s16 = sadd.s32 1, %s455_s11 }
   0x7   : > { %s22_s17 = ssub.s32 %s459_s12, %s501_s15  ;;  %p32_p0 = scmp.ne.s32.totalorder %s455_s11, %s451_s10 }
   0x8   : > { %p23_p1 = scmp.eq.s32.totalorder %s22_s17, 0  ;;  %p33_p2 = scmp.eq.s32.totalorder %s459_s12, 0 }
   0x9   : > { %p38_p3 = scmp.ne.s32.totalorder %s451_s10, %s447_s9  ;;  %p39_p4 = scmp.eq.s32.totalorder %s497_s13, 0 }
   0xa   : > { %s513_s18 = scalar_select %p23_p1, %s455_s11, %s25_s16  }
   0xb   : > { %p515_p5 = por %p33_p2, %p32_p0  ;;  %p519_p6 = por %p39_p4, %p38_p3 }
   0xc   : > { %p83_p7 = scmp.eq.s32.totalorder %s497_s13, 3  ;;  %p89_p8 = scmp.eq.s32.totalorder %s298_s14, 3 }
   0xd   : > { %p327_p9 = scmp.lt.s32.totalorder %s459_s12, 4  ;;  %s112_s23 = sand.u32 1, %s455_s11  }
   0xe   : > { %p525_p10 = por %p83_p7, %p32_p0  ;;  %p529_p11 = por %p89_p8, %p38_p3 }
   0xf   : > { %s313_s24 = sshll.u32 %s459_s12, 4  ;;  %s301_s25 = sshll.u32 %s112_s23, 4 }
  0x10   : > { %s121_s28 = scalar_lea.hbm %s611_s0, %s313_s24  ;;  %s116_s30 = scalar_lea.vmem [#allocation2], %s301_s25 }
  0x11   : > { %s123_s29 = sshll.u32 %s121_s28, 4  ;;  %s125_s3 = sshll.u32 %s116_s30, 4  ;;  %s124_s29 = int_to_ptr.hbm [resolvable:$true] %s123_s29  ;;  %s126_s3 = int_to_ptr.vmem [resolvable:$true] %s125_s3 }
  0x12   : > { %p540_p12 = pnand %p327_p9, %p515_p5  ;;  %p304_p13 = scmp.ge.s32.totalorder %s459_s12, 1 }
  0x13   : > { %p130_p0 = scmp.lt.s32.totalorder %s459_s12, 5  ;;  %s113_s5 = scalar_lea.sflag [#allocation3], %s112_s23 }
  0x14   : > { %s363_s6 = sshra.s32 %s124_s29, 4  ;;  %p367_p2 = pneg %p540_p12  ;;  %s364_s6 = int_to_ptr.hbm [resolvable:$true] %s363_s6 }
  0x15   : > { %s365_s7 = scalar_lea.hbm %s364_s6, 16  ;;  %s370_s16 = scalar_lea.hbm %s611_s0, 64 }
  0x16   : > { %p366_p1 = scmp.ne.s32.totalorder %s364_s6, %s365_s7  ;;  %p371_p5 = scmp.lt.s32.totalorder %s364_s6, %s611_s0 }
  0x17   : > { %p372_p7 = scmp.lt.s32.totalorder %s370_s16, %s365_s7 }
  0x18   : > { %p368_p3 = pnand %p367_p2, %p366_p1 }
  0x19   : > { %p373_p8 = por %p372_p7, %p371_p5 }
  0x1a   : > { %p369_p4 = pneg %p368_p3 }
  0x1c   : > { %p374_p9 = pnand %p373_p8, %p369_p4 }
  0x1e   : > { %377 = shalt.err (!%p374_p9)
}
  0x1f   : > { %322 = dma.hbm_to_vmem [thread:$0]  (!%p540_p12), %s124_s29, 256, %s126_s3, %s113_s5  }
  0x20   : > { %p131_p1 = pnand %p304_p13, %p130_p0 }
  0x21   : > { %s561_s23 = sand.u32 (!%p131_p1), 1, %s451_s10  }
  0x22   : > { %134 = sbr.rel (%p131_p1) target bundleno = 203 (0xcb), region = 28  ;;  %s305_s24 = sshll.u32 (!%p131_p1), %s561_s23, 4 }
  0x23   : > { %s137_s25 = scalar_lea.sflag (!%p131_p1), [#allocation3], %s561_s23  ;;  %s140_s26 = scalar_lea.vmem (!%p131_p1), [#allocation2], %s305_s24 }
  0x27   : > { %438 = dma.done.wait (%p519_p6), %s137_s25, 256  }
  0x28   : > { %440 = vsyncadd (%p519_p6), %s137_s25, 4294967040  ;;  %v162_v0 = vld [vmem:[%s140_s26] sm:$0xff]  ;;  %v163_v1 = vld [vmem:[%s140_s26 + $0x8] sm:$0xff]  ;;  %s314_s28 = sshll.u32 %s497_s13, 4  ;;  %s161_s13 = scalar_lea.vmem [#allocation5], %s305_s24 }
  0x29   : > { %v164_v2 = vadd.f32 %v163_v1, %v162_v0  ;;  %v168_v3 = vmul.f32 %v162_v0, %v162_v0  ;;  %v169_v4 = vmul.f32 %v163_v1, %v163_v1  ;;  %v188_v18 = vld [vmem:[%s612_s1] ss:$2 sm:$0x3]  ;;  %v307_v21 = vld [vmem:[%s612_s1 + $0x1] ss:$2 sm:$0x3]  ;;  %s223_s5 = scalar_lea.hbm %s613_s2, %s314_s28 }
  0x2a   : > { %v196_v24 = vperm.slane %v188_v18, 0  ;;  %v197_v25 = vperm.slane %v188_v18, 1  ;;  %v203_v29 = vperm.slane %v307_v21, 0  ;;  %v204_v30 = vperm.slane %v307_v21, 1  ;;  %s225_s6 = sshll.u32 %s161_s13, 4  ;;  %s227_s7 = sshll.u32 %s223_s5, 4  ;;  %s226_s6 = int_to_ptr.vmem [resolvable:$true] %s225_s6  ;;  %s228_s7 = int_to_ptr.hbm [resolvable:$true] %s227_s7 }
  0x2b   : > { %165 = vadd.xlane.f32.xlu0 %v164_v2  ;;  %v170_v5 = vadd.f32 %v169_v4, %v168_v3  ;;  %s212_s8 = scalar_lea.sflag [#allocation4], %s561_s23  ;;  %s407_s14 = sshra.s32 %s228_s7, 4  ;;  %s408_s14 = int_to_ptr.hbm [resolvable:$true] %s407_s14 }
  0x2c   : > { %s409_s16 = scalar_lea.hbm %s408_s14, 16  ;;  %s413_s24 = scalar_lea.hbm %s613_s2, 64 }
  0x2d   : > { %p410_p6 = scmp.ne.s32.totalorder %s408_s14, %s409_s16  ;;  %p414_p0 = scmp.lt.s32.totalorder %s408_s14, %s613_s2 }
  0x2e   : > { %p415_p2 = scmp.lt.s32.totalorder %s413_s24, %s409_s16 }
  0x2f   : > { %p411_p12 = pnand %p410_p6, %p525_p10 }
  0x30   : > { %p416_p3 = por %p415_p2, %p414_p0 }
  0x31   : > { %p412_p13 = pneg %p411_p12 }
  0x33   : > { %171 = vadd.xlane.f32.xlu0 %v170_v5  ;;  %p417_p4 = pnand %p416_p3, %p412_p13 }
  0x9e   : > { %v166_v6 = vpop.xlane.xlu0 %165 }
  0x9f   : > { %v167_v7 = vmul.f32 0.00390625, %v166_v6 }
  0xa1   : > { %v174_v9 = vmul.f32 %v167_v7, %v167_v7  ;;  %v191_v22 = vsub.f32 %v162_v0, %v167_v7  ;;  %v192_v23 = vsub.f32 %v163_v1, %v167_v7 }
  0xa6   : > { %v172_v8 = vpop.xlane.xlu0 %171 }
  0xa7   : > { %v173_v10 = vmul.f32 0.00390625, %v172_v8 }
  0xa9   : > { %v175_v11 = vsub.f32 %v173_v10, %v174_v9 }
  0xab   : > { %v176_v12 = vmax.f32 %v175_v11, 0.0 }
  0xad   : > { %v177_v13 = vadd.f32 1e-05, %v176_v12 }
  0xaf   : > { %361 = vrsqrt.f32 %v177_v13  ;;  %vm184_vm1 = vweird.f32 %v177_v13 }
  0xb5   : > { %v362_v14 = vpop.eup %361 }
  0xb6   : > { %v179_v15 = vmul.f32 %v362_v14, %v177_v13  ;;  %vm185_vm0 = vweird.f32 %v362_v14 }
  0xb7   : > { %vm186_vm2 = vmor %vm184_vm1, %vm185_vm0 }
  0xb8   : > { %v180_v16 = vmul.f32 %v362_v14, %v179_v15 }
  0xba   : > { %v181_v17 = vmul.f32 0.5, %v180_v16 }
  0xbc   : > { %v182_v19 = vsub.f32 1.5, %v181_v17 }
  0xbe   : > { %v183_v20 = vmul.f32 %v362_v14, %v182_v19 }
  0xc0   : > { %v187_v26 = vsel %vm186_vm2, %v362_v14, %v183_v20 }
  0xc1   : > { %v193_v27 = vmul.f32 %v191_v22, %v187_v26  ;;  %v194_v28 = vmul.f32 %v192_v23, %v187_v26 }
  0xc3   : > { %v200_v31 = vmul.f32 %v196_v24, %v193_v27  ;;  %v201_v32 = vmul.f32 %v197_v25, %v194_v28 }
  0xc5   : > { %v207_v33 = vadd.f32 %v203_v29, %v200_v31  ;;  %v208_v34 = vadd.f32 %v204_v30, %v201_v32 }
  0xc7   : > { %209 = vst [vmem:[%s161_s13] sm:$0xff] %v207_v33 }
  0xc8   : > { %210 = vst [vmem:[%s161_s13 + $0x8] sm:$0xff] %v208_v34 }
  0xc9   : > { %420 = shalt.err (!%p417_p4)
}
  0xca   : > { %317 = dma.vmem_to_hbm [thread:$0]  (%p525_p10), %s226_s6, 256, %s228_s7, %s212_s8  }
  0xcb PF: > { %p328_p5 = scmp.ge.s32.totalorder %s459_s12, 2  ;;  %s239_s23 = sand.u32 1, %s447_s9  }
  0xcc   : > { %s240_s20 = scalar_lea.sflag [#allocation4], %s239_s23 }
  0xcd   : > { %p324_p7 = pnand %p328_p5, %p529_p11 }
  0xcf   : > { %p325_p8 = pneg %p324_p7 }
  0xd1   : > { %442 = dma.done.wait (%p325_p8), %s240_s20, 256  }
  0xd2   : > { %444 = vsyncadd (%p325_p8), %s240_s20, 4294967040  ;;  %p15_p9 = scmp.ge.s32.totalorder %s501_s15, 6   ;;  %s619_s9 = smov %s451_s10 }
  0xd3   : > { %s620_s10 = smov %s455_s11  ;;  %s621_s11 = smov %s513_s18 }
  0xd4   : > { %s622_s12 = smov %s501_s15  ;;  %17 = sbr.rel (!%p15_p9) target bundleno = 5 (0x5), region = 74 }
  0xd9   :  { %246 = vsyncpa [#allocation3], 1 }
  0xda   :  { %248 = vsyncpa [#allocation3 + $0x1], 1 }
  0xdb   :  { %249 = vsyncpa [#allocation4], 1 }
  0xdc   :  { %251 = vsyncpa [#allocation4 + $0x1], 1 }

</bundles_post_ra>
